<compile_context>
chip_gen: v6e
topology: v6e:2x2x1
jax: 0.10.0
libtpu: 0.0.40
codegen_flags: <defaults>
</compile_context>

<pallas_src>
import jax
import jax.numpy as jnp
from jax.experimental import pallas as pl
from jax.experimental.pallas import tpu as pltpu


# ---------------------------------------------------------------------------
# Tunables (per perf review: byte-budget-driven tiles, >=4 grid steps).
# ---------------------------------------------------------------------------
_LANE_WIDTH = 512                 # C: lanes per block, multiple of 128
_TARGET_STEP_ELEMS = 256 * 1024   # ~4 MB of real HBM traffic per grid step
_MIN_STEPS = 4                    # let v7x's two TCs + double-buffering engage
_PALLAS_MIN_ROWS = 32768          # below this, plain XLA is faster end-to-end


def _round_up(x: int, m: int) -> int:
    return ((x + m - 1) // m) * m


def _choose_tiles(n: int):
    """Returns (C, R_pad, TR): lane width, padded row count, rows per grid step."""
    c = _LANE_WIDTH
    r = -(-n // c)                       # cdiv(n, C)
    r_pad = _round_up(max(r, 1), 8)      # sublane alignment only (cheap)
    # Rows per step from the HBM byte budget (16 B / batch element).
    tr = max(8, (_TARGET_STEP_ELEMS // c) // 8 * 8)
    # Cap so we get at least _MIN_STEPS grid steps when there are enough rows.
    tr_cap = max(8, (r_pad // _MIN_STEPS) // 8 * 8)
    tr = min(tr, tr_cap, r_pad)
    return c, r_pad, tr


def linear_kernel(wb_ref, x_ref, o_ref):
    """wb_ref: SMEM (4,) = [w0, w1, w2, b]; x_ref: VMEM (3, TR, C); o_ref: VMEM (TR, C)."""
    w0 = wb_ref[0]
    w1 = wb_ref[1]
    w2 = wb_ref[2]
    b = wb_ref[3]
    # Full-vreg (TR, C) planes: pure VPU FMAs, no sublane extraction, no MXU.
    y = x_ref[0] * w0 + x_ref[1] * w1 + x_ref[2] * w2 + b
    o_ref[...] = y.astype(o_ref.dtype)


@jax.jit
def _regression_pallas(x, wb):
    """x: (N, 3) f32, wb: (4,) f32 -> (N, 1) f32 via the Pallas kernel."""
    n = x.shape[0]
    c, r_pad, tr = _choose_tiles(n)
    n_pad = r_pad * c
    grid = (pl.cdiv(r_pad, tr),)

    # Layout plumbing: pad rows (only up to R_pad*C), go feature-major, then
    # fold the batch onto (sublane, lane). Under jit this is ONE fused copy.
    x_pad = jnp.pad(x, ((0, n_pad - n), (0, 0)))     # (n_pad, 3)
    x3 = x_pad.T.reshape(3, r_pad, c)                # (3, R_pad, C)

    out = pl.pallas_call(
        linear_kernel,
        out_shape=jax.ShapeDtypeStruct((r_pad, c), jnp.float32),
        grid=grid,
        in_specs=[
            pl.BlockSpec(memory_space=pltpu.MemorySpace.SMEM),      # wb: 4 scalars
            pl.BlockSpec((3, tr, c), lambda i: (0, i, 0)),          # x block
        ],
        out_specs=pl.BlockSpec((tr, c), lambda i: (i, 0)),          # lane-dense out
        compiler_params=pltpu.CompilerParams(
            dimension_semantics=("parallel",),
            vmem_limit_bytes=32 * 1024 * 1024,
        ),
        cost_estimate=pl.CostEstimate(
            flops=6 * n_pad,                    # 3 mul + 3 add per output element
            transcendentals=0,
            bytes_accessed=(3 * n_pad + n_pad + 4) * 4,
        ),
    )(wb, x3)

    # Drop padding, restore (N, 1) like nn.Linear(3, 1). Row r*C + c of the
    # flattened (R_pad, C) output is exactly original batch index r*C + c.
    return out.reshape(-1)[:n].reshape(n, 1)


def regression_model(x, weight, bias, *, use_pallas=None):
    """x: (N, 3); weight: (1, 3); bias: (1,) -> (N, 1), all f32."""
    n, f = x.shape
    assert f == 3, "Regressionmodel expects in_features=3"
    x = x.astype(jnp.float32)
    w = weight.reshape(1, 3).astype(jnp.float32)
    b = bias.reshape(-1).astype(jnp.float32)

    if use_pallas is None:
        use_pallas = n >= _PALLAS_MIN_ROWS

    if not use_pallas:
        # Small/medium N: one XLA pass on the native (N, 3) layout beats any
        # transpose + per-step kernel overhead.
        return x @ w.T + b

    wb = jnp.concatenate([w.reshape(-1), b])          # (4,) scalars for SMEM
    return _regression_pallas(x, wb)


if __name__ == "__main__":
    key = jax.random.PRNGKey(0)
    kx, kw, kb = jax.random.split(key, 3)

    F = 3
    # Deterministic parameter init (mimics nn.Linear's uniform(-1/sqrt(3), 1/sqrt(3))).
    bound = 1.0 / jnp.sqrt(jnp.float32(F))
    weight = jax.random.uniform(kw, (1, F), minval=-bound, maxval=bound, dtype=jnp.float32)
    bias = jax.random.uniform(kb, (1,), minval=-bound, maxval=bound, dtype=jnp.float32)

    # --- Pallas path (forced), ragged N to exercise padding/masking ----------
    N = 2500
    x = jax.random.normal(kx, (N, F), dtype=jnp.float32)
    out = regression_model(x, weight, bias, use_pallas=True)
    out = jax.block_until_ready(out)
    ref = x @ weight.T + bias
    assert out.shape == (N, 1)
    assert jnp.allclose(out, ref, atol=1e-5, rtol=1e-5)

    # --- Small-N fallback path (plain XLA) -----------------------------------
    N2 = 8
    x2 = jax.random.normal(kx, (N2, F), dtype=jnp.float32)
    out2 = jax.block_until_ready(regression_model(x2, weight, bias))
    ref2 = x2 @ weight.T + bias
    assert out2.shape == (N2, 1)
    assert jnp.allclose(out2, ref2, atol=1e-5, rtol=1e-5)

    print("KERNEL_OK")
</pallas_src>

<mosaic_0001>
module attributes {stable_mosaic.version = 11 : i64} {
  func.func @linear_kernel(%arg0: i32, %arg1: memref<4xf32, #tpu.memory_space<smem>>, %arg2: memref<3x8x512xf32, #tpu.memory_space<vmem>>, %arg3: memref<8x512xf32, #tpu.memory_space<vmem>>) attributes {dimension_semantics = [#tpu.dimension_semantics<parallel>], iteration_bounds = array<i64: 1>, scalar_prefetch = 0 : i64, scratch_operands = 0 : i64, tpu.core_type = #tpu.core_type<tc>, window_params = [{transform_indices = @transform_0, window_bounds = array<i64: 4>}, {transform_indices = @transform_1, window_bounds = array<i64: 3, 8, 512>}, {transform_indices = @transform_2, window_bounds = array<i64: 8, 512>}]} {
    %c0 = arith.constant 0 : index
    %0 = memref.load %arg1[%c0] : memref<4xf32, #tpu.memory_space<smem>>
    %c1 = arith.constant 1 : index
    %1 = memref.load %arg1[%c1] : memref<4xf32, #tpu.memory_space<smem>>
    %c2 = arith.constant 2 : index
    %2 = memref.load %arg1[%c2] : memref<4xf32, #tpu.memory_space<smem>>
    %c3 = arith.constant 3 : index
    %3 = memref.load %arg1[%c3] : memref<4xf32, #tpu.memory_space<smem>>
    %c0_0 = arith.constant 0 : index
    %c0_1 = arith.constant 0 : index
    %c0_2 = arith.constant 0 : index
    %4 = vector.load %arg2[%c0_0, %c0_1, %c0_2] : memref<3x8x512xf32, #tpu.memory_space<vmem>>, vector<1x8x512xf32>
    %5 = vector.shape_cast %4 : vector<1x8x512xf32> to vector<8x512xf32>
    %6 = vector.broadcast %0 : f32 to vector<8x512xf32>
    %7 = arith.mulf %5, %6 : vector<8x512xf32>
    %c1_3 = arith.constant 1 : index
    %c0_4 = arith.constant 0 : index
    %c0_5 = arith.constant 0 : index
    %8 = vector.load %arg2[%c1_3, %c0_4, %c0_5] : memref<3x8x512xf32, #tpu.memory_space<vmem>>, vector<1x8x512xf32>
    %9 = vector.shape_cast %8 : vector<1x8x512xf32> to vector<8x512xf32>
    %10 = vector.broadcast %1 : f32 to vector<8x512xf32>
    %11 = arith.mulf %9, %10 : vector<8x512xf32>
    %12 = arith.addf %7, %11 : vector<8x512xf32>
    %c2_6 = arith.constant 2 : index
    %c0_7 = arith.constant 0 : index
    %c0_8 = arith.constant 0 : index
    %13 = vector.load %arg2[%c2_6, %c0_7, %c0_8] : memref<3x8x512xf32, #tpu.memory_space<vmem>>, vector<1x8x512xf32>
    %14 = vector.shape_cast %13 : vector<1x8x512xf32> to vector<8x512xf32>
    %15 = vector.broadcast %2 : f32 to vector<8x512xf32>
    %16 = arith.mulf %14, %15 : vector<8x512xf32>
    %17 = arith.addf %12, %16 : vector<8x512xf32>
    %18 = vector.broadcast %3 : f32 to vector<8x512xf32>
    %19 = arith.addf %17, %18 : vector<8x512xf32>
    %c0_9 = arith.constant 0 : index
    %c0_10 = arith.constant 0 : index
    %20 = vector.load %arg3[%c0_9, %c0_10] : memref<8x512xf32, #tpu.memory_space<vmem>>, vector<8x512xf32>
    tpu.vector_store %arg3[%c0_9, %c0_10], %19 {strides = array<i32>} : memref<8x512xf32, #tpu.memory_space<vmem>>, vector<8x512xf32>,
    return
  }
  func.func @transform_0(%arg0: i32) -> i32 {
    %c0_i32 = arith.constant 0 : i32
    %c0_i32_0 = arith.constant 0 : i32
    return %c0_i32 : i32
  }
  func.func @transform_1(%arg0: i32) -> (i32, i32, i32) {
    %c0_i32 = arith.constant 0 : i32
    %c0_i32_0 = arith.constant 0 : i32
    %c0_i32_1 = arith.constant 0 : i32
    return %c0_i32, %arg0, %c0_i32_0 : i32, i32, i32
  }
  func.func @transform_2(%arg0: i32) -> (i32, i32) {
    %c0_i32 = arith.constant 0 : i32
    %c0_i32_0 = arith.constant 0 : i32
    return %arg0, %c0_i32 : i32, i32
  }
}

</mosaic_0001>

<bundles_post_ra>
// kernel: _regression_pallas.1
= control target key start
LH: loop header
LB: loop body
LE: loop exit
PB: predicated region body
PF: predicated region fallthrough
CT: control target
= control target key end

     0   :  { %7 = vsyncpa [#allocation3], 0  ;;  %s172_s0 = inlined_call_operand.vmem [shape: f32[4], index: 0, kind: input, shape index: {}]   ;;  %s173_s1 = inlined_call_operand.vmem [shape: f32[3,8,512], index: 1, kind: input, shape index: {}]   ;;  %s174_s2 = inlined_call_operand.vmem [shape: f32[8,512], index: 2, kind: output, shape index: {}]  }
   0x1   :  { %s14_s11 = sshll.u32 %s172_s0, 4  ;;  %s15_s11 = int_to_ptr.vmem [resolvable:$true] %s14_s11 }
   0x2   :  { %s91_s12 = scalar_lea.vmem %s15_s11, 16  ;;  %p96_p1 = scmp.lt.s32.totalorder %s15_s11, %s15_s11 }
   0x3   :  { %p92_p0 = scmp.ne.s32.totalorder %s15_s11, %s91_s12  ;;  %p97_p2 = scmp.lt.s32.totalorder %s91_s12, %s91_s12 }
   0x5   :  { %p98_p3 = por %p97_p2, %p96_p1 }
   0x7   :  { %p99_p4 = pnand %p98_p3, %p92_p0 }
   0x9   :  { %102 = shalt.err (!%p99_p4)
}
   0xa   :  { %s105_s13 = smov [#allocation2]  }
   0xb   :  { %17 = dma.vmem_to_smem %s15_s11, 16, %s105_s13, [#allocation3]  }
   0xc   :  { %103 = dma.done.wait [#allocation3], 16  }
   0xd   :  { %104 = vsyncadd [#allocation3], 4294967280 }
   0xe   :  { %23 = sfence }
   0xf   :  { %s24_s14 = sld [smem:[#allocation2]]  ;;  %v28_v0 = vld [vmem:[%s173_s1] sm:$0xff]  ;;  %v29_v1 = vld [vmem:[%s173_s1 + $0x8] sm:$0xff]  ;;  %v30_v2 = vld [vmem:[%s173_s1 + $0x10] sm:$0xff] }
  0x10   :  { %s79_s15 = sld [smem:[#allocation2 + $0x1]]  ;;  %v82_v3 = vld [vmem:[%s173_s1 + $0x20] sm:$0xff]  ;;  %v83_v4 = vld [vmem:[%s173_s1 + $0x28] sm:$0xff]  ;;  %v84_v5 = vld [vmem:[%s173_s1 + $0x30] sm:$0xff] }
  0x11   :  { %s80_s16 = sld [smem:[#allocation2 + $0x2]]  ;;  %v86_v7 = vld [vmem:[%s173_s1 + $0x40] sm:$0xff]  ;;  %v87_v8 = vld [vmem:[%s173_s1 + $0x48] sm:$0xff]  ;;  %v88_v9 = vld [vmem:[%s173_s1 + $0x50] sm:$0xff] }
  0x12   :  { %s81_s17 = sld [smem:[#allocation2 + $0x3]]  ;;  %v31_v14 = vld [vmem:[%s173_s1 + $0x18] sm:$0xff] }
  0x13   :  { %v85_v19 = vld [vmem:[%s173_s1 + $0x38] sm:$0xff] }
  0x14   :  { %v89_v20 = vld [vmem:[%s173_s1 + $0x58] sm:$0xff] }
  0x15   :  { %v32_v6 = vstv %s24_s14 }
  0x16   :  { %v33_v10 = vmul.f32 %v32_v6, %v28_v0  ;;  %v42_v11 = vstv %s79_s15  ;;  %v34_v12 = vmul.f32 %v32_v6, %v29_v1  ;;  %v35_v13 = vmul.f32 %v32_v6, %v30_v2 }
  0x17   :  { %v43_v15 = vmul.f32 %v82_v3, %v42_v11  ;;  %v56_v16 = vstv %s80_s16  ;;  %v44_v17 = vmul.f32 %v83_v4, %v42_v11  ;;  %v45_v18 = vmul.f32 %v84_v5, %v42_v11 }
  0x18   :  { %v57_v21 = vmul.f32 %v86_v7, %v56_v16  ;;  %v58_v22 = vmul.f32 %v87_v8, %v56_v16  ;;  %v59_v23 = vmul.f32 %v88_v9, %v56_v16  ;;  %v36_v27 = vmul.f32 %v32_v6, %v31_v14 }
  0x19   :  { %v47_v24 = vadd.f32 %v43_v15, %v33_v10  ;;  %v48_v25 = vadd.f32 %v44_v17, %v34_v12  ;;  %v49_v26 = vadd.f32 %v45_v18, %v35_v13  ;;  %v65_v28 = vstv %s81_s17 }
  0x1a   :  { %v46_v29 = vmul.f32 %v85_v19, %v42_v11  ;;  %v60_v30 = vmul.f32 %v89_v20, %v56_v16 }
  0x1b   :  { %v61_v31 = vadd.f32 %v57_v21, %v47_v24  ;;  %v62_v32 = vadd.f32 %v58_v22, %v48_v25  ;;  %v63_v33 = vadd.f32 %v59_v23, %v49_v26 }
  0x1c   :  { %v50_v34 = vadd.f32 %v46_v29, %v36_v27 }
  0x1d   :  { %v66_v35 = vadd.f32 %v65_v28, %v61_v31  ;;  %v67_v36 = vadd.f32 %v65_v28, %v62_v32  ;;  %v68_v37 = vadd.f32 %v65_v28, %v63_v33 }
  0x1e   :  { %v64_v38 = vadd.f32 %v60_v30, %v50_v34 }
  0x1f   :  { %70 = vst [vmem:[%s174_s2] sm:$0xff] %v66_v35  ;;  %71 = vst [vmem:[%s174_s2 + $0x8] sm:$0xff] %v67_v36 }
  0x20   :  { %72 = vst [vmem:[%s174_s2 + $0x10] sm:$0xff] %v68_v37  ;;  %v69_v39 = vadd.f32 %v65_v28, %v64_v38 }
  0x22   :  { %73 = vst [vmem:[%s174_s2 + $0x18] sm:$0xff] %v69_v39 }
  0x23   :  { %78 = vsyncpa [#allocation3], 1 }

</bundles_post_ra>
